<compile_context>
chip_gen: v7x
topology: tpu7x:2x2x1
jax: 0.10.0
libtpu: 0.0.40
codegen_flags: <defaults>
</compile_context>

<pallas_src>
from functools import partial

import jax
import jax.numpy as jnp
from jax.experimental import pallas as pl
from jax.experimental.pallas import tpu as pltpu


_NEG_BIG = jnp.finfo(jnp.float32).min  # finite "-inf" for masked logit columns


# ----------------------------------------------------------------------------
# Pallas kernel:  (mean-patches @ flattened-conv-weight)  ->  (log_)softmax
# ----------------------------------------------------------------------------
def _slot_head_kernel(mp_ref, w_ref, out_ref, *, softmax: bool, num_valid: int):
    # mp_ref  : (TB, Kp)   spatially averaged im2col patches, zero-padded cols (f32)
    # w_ref   : (Kp, Cp)   flattened conv weight, zero-padded rows/cols (f32)
    # out_ref : (TB, Cp)   log-probs / probs, lane-dense (f32)
    #
    # logits[b, o] = mean_{ho,wo} conv(x, w)[b, o, ho, wo]
    #             = (mean_P patches[b]) @ W_flat          (conv is linear)
    logits = jnp.dot(mp_ref[...], w_ref[...],
                     preferred_element_type=jnp.float32)        # (TB, Cp) f32
    tb, cp = out_ref.shape
    if num_valid < cp:
        # Padded (zero-weight) classes must not participate in the softmax.
        col = jax.lax.broadcasted_iota(jnp.int32, (tb, cp), 1)
        logits = jnp.where(col < num_valid, logits, _NEG_BIG)
    # Numerically stable (log_)softmax over the class axis, in f32.
    m = jnp.max(logits, axis=-1, keepdims=True)
    shifted = logits - m
    e = jnp.exp(shifted)
    s = jnp.sum(e, axis=-1, keepdims=True)
    if softmax:
        out_ref[...] = e * pl.reciprocal(s, approx=True)        # F.softmax
    else:
        out_ref[...] = shifted - jnp.log(s)                     # F.log_softmax


# ----------------------------------------------------------------------------
# Glue: spatial mean of the im2col patches of the 3x3 / stride-2 / pad-1 stem
# conv, computed from valid strided slices of x only (no padded copy, no
# (B, P, K) patch tensor).  XLA fuses the 9 slice+sum taps into one pass.
# ----------------------------------------------------------------------------
def _mean_im2col(x, kh=3, kw=3, stride=2, pad=1):
    """(B, C, H, W) f32 -> (B, kh*kw*C); taps-major / Cin-minor layout."""
    B, C, H, W = x.shape
    Ho = (H + 2 * pad - kh) // stride + 1
    Wo = (W + 2 * pad - kw) // stride + 1

    def valid_slice(dim, off, out_dim):
        start = off - pad
        o_lo = 0 if start >= 0 else ((-start) + stride - 1) // stride
        o_hi = min(out_dim - 1, (dim - 1 - start) // stride)
        lo = start + stride * o_lo
        hi = start + stride * o_hi
        return lo, hi + 1                                        # python slice bounds

    inv_area = 1.0 / float(Ho * Wo)
    taps = []
    for i in range(kh):
        hlo, hhi = valid_slice(H, i, Ho)
        for j in range(kw):
            wlo, whi = valid_slice(W, j, Wo)
            tap = x[:, :, hlo:hhi:stride, wlo:whi:stride]
            taps.append(jnp.sum(tap, axis=(2, 3)) * inv_area)    # (B, C)
    mp = jnp.stack(taps, axis=1)                                 # (B, kh*kw, C)
    return mp.reshape(B, kh * kw * C)                            # (B, K)


def _round_up(n, m):
    return (n + m - 1) // m * m


def _choose_tb(b):
    """Batch tile: >= 8-row sublane-dense blocks, cap 1024; keep >= 2 tiles for
    larger batches so the 'parallel' batch axis can split across v7x's 2 TCs."""
    bp = _round_up(b, 8)
    if bp <= 16:
        return bp
    return min(1024, _round_up(pl.cdiv(bp, 2), 8))


# ----------------------------------------------------------------------------
# Wrapper: SlotModel.forward (use_slot=False, target=None)
# ----------------------------------------------------------------------------
@partial(jax.jit, static_argnames=("softmax",))
def slot_model_forward(x, conv1_weight, *, softmax: bool = False):
    """x: (B, Cin, H, W) NCHW float32.  conv1_weight: (Cout, Cin, 3, 3) OIHW."""
    B = x.shape[0]
    Cout, Cin, kh, kw = conv1_weight.shape

    # Prologue: spatial mean of im2col patches (f32), fused one pass over x.
    mp = _mean_im2col(x.astype(jnp.float32), kh=kh, kw=kw, stride=2, pad=1)
    K = mp.shape[1]
    # Flatten weight to (K, Cout): taps-major, Cin-minor — matches mp layout.
    w2 = conv1_weight.astype(jnp.float32).transpose(2, 3, 1, 0).reshape(K, Cout)

    # Pad to lane-dense shapes: K -> Kp (zero rows in w contribute nothing),
    # Cout -> Cp (padded logit columns masked to -inf inside the kernel).
    Kp = _round_up(K, 128)
    Cp = _round_up(Cout, 128)
    TB = _choose_tb(B)
    Bp = _round_up(B, TB)

    mp_p = jnp.pad(mp, ((0, Bp - B), (0, Kp - K)))
    w_p = jnp.pad(w2, ((0, Kp - K), (0, Cp - Cout)))

    cost = pl.CostEstimate(
        flops=2 * Bp * Kp * Cp + 6 * Bp * Cp,
        transcendentals=Bp * Cp + Bp,
        bytes_accessed=Bp * Kp * 4 + Kp * Cp * 4 + Bp * Cp * 4,
    )

    out = pl.pallas_call(
        partial(_slot_head_kernel, softmax=softmax, num_valid=Cout),
        out_shape=jax.ShapeDtypeStruct((Bp, Cp), jnp.float32),
        grid_spec=pltpu.PrefetchScalarGridSpec(
            num_scalar_prefetch=0,
            grid=(Bp // TB,),
            in_specs=[
                pl.BlockSpec((TB, Kp), lambda b: (b, 0)),        # mean patches
                pl.BlockSpec((Kp, Cp), lambda b: (0, 0)),        # shared weight
            ],
            out_specs=pl.BlockSpec((TB, Cp), lambda b: (b, 0)),  # lane-dense
        ),
        compiler_params=pltpu.CompilerParams(
            dimension_semantics=("parallel",),   # batch tiles are independent
        ),
        cost_estimate=cost,
    )(mp_p, w_p)
    return out[:B, :Cout]


def nll_loss_from_log_probs(log_probs, target):
    """F.nll_loss on the kernel output (glue; matches the `target is not None` path)."""
    picked = jnp.take_along_axis(log_probs, target[:, None], axis=1)[:, 0]
    return -jnp.mean(picked)


# ----------------------------------------------------------------------------
if __name__ == "__main__":
    key = jax.random.PRNGKey(0)
    kx, kw_key = jax.random.split(key)

    B, Cin, H, W = 2, 3, 16, 16      # (B, 3, H, W) as in the forward docstring
    Cout = 64                        # stem conv from load_backbone

    x = jax.random.normal(kx, (B, Cin, H, W), dtype=jnp.float32)
    # Deterministic Kaiming-style init for the conv weight (bias=False).
    w = (jax.random.normal(kw_key, (Cout, Cin, 3, 3), dtype=jnp.float32)
         * (2.0 / (Cin * 9)) ** 0.5)

    out = jax.block_until_ready(slot_model_forward(x, w, softmax=False))

    # Pure-JAX f32 reference of the same forward pass for a sanity check.
    feat_ref = jax.lax.conv_general_dilated(
        x, w, window_strides=(2, 2), padding=((1, 1), (1, 1)),
        dimension_numbers=("NCHW", "OIHW", "NCHW"))
    logits_ref = jnp.mean(feat_ref, axis=(2, 3))
    out_ref = jax.nn.log_softmax(logits_ref, axis=1)
    assert out.shape == (B, Cout)
    # f32 operands end-to-end -> tight tolerance on the log-prob path.
    assert jnp.allclose(out, out_ref, atol=1e-4, rtol=1e-4)

    # softmax=True branch (probabilities; uses approx reciprocal on the EUP).
    probs = jax.block_until_ready(slot_model_forward(x, w, softmax=True))
    assert jnp.allclose(jnp.sum(probs, axis=1), 1.0, atol=1e-2)
    assert jnp.allclose(probs, jax.nn.softmax(logits_ref, axis=1),
                        atol=1e-3, rtol=1e-2)

    # Optional loss path (target is not None), done as glue on kernel output.
    target = jnp.array([1, 3], dtype=jnp.int32)
    loss = jax.block_until_ready(nll_loss_from_log_probs(out, target))
    assert jnp.isfinite(loss)

    print("KERNEL_OK")
</pallas_src>

<mosaic_0001>
module attributes {stable_mosaic.version = 11 : i64} {
  func.func @_slot_head_kernel(%arg0: i32, %arg1: memref<8x128xf32, #tpu.memory_space<vmem>>, %arg2: memref<128x128xf32, #tpu.memory_space<vmem>>, %arg3: memref<8x128xf32, #tpu.memory_space<vmem>>) attributes {dimension_semantics = [#tpu.dimension_semantics<parallel>], iteration_bounds = array<i64: 1>, scalar_prefetch = 0 : i64, scratch_operands = 0 : i64, tpu.core_type = #tpu.core_type<tc>, window_params = [{transform_indices = @transform_0, window_bounds = array<i64: 8, 128>}, {pipeline_mode = #tpu.pipeline_mode<synchronous>, transform_indices = @transform_1, window_bounds = array<i64: 128, 128>}, {transform_indices = @transform_2, window_bounds = array<i64: 8, 128>}]} {
    %c0 = arith.constant 0 : index
    %c0_0 = arith.constant 0 : index
    %0 = vector.load %arg1[%c0, %c0_0] : memref<8x128xf32, #tpu.memory_space<vmem>>, vector<8x128xf32>
    %c0_1 = arith.constant 0 : index
    %c0_2 = arith.constant 0 : index
    %1 = vector.load %arg2[%c0_1, %c0_2] : memref<128x128xf32, #tpu.memory_space<vmem>>, vector<128x128xf32>
    %cst = arith.constant dense<0.000000e+00> : vector<8x128xf32>
    %2 = tpu.matmul %0, %1, %cst {dimension_numbers = #tpu.dot_dimension_numbers<[1], [0], [0], [1], [0, 0, 1, 1], [], []>} : vector<8x128xf32>, vector<128x128xf32>, vector<8x128xf32> -> vector<8x128xf32>
    %3 = tpu.iota {dimensions = array<i32: 1>} : vector<8x128xi32>
    %c64_i32 = arith.constant 64 : i32
    %4 = vector.broadcast %c64_i32 : i32 to vector<8x128xi32>
    %5 = arith.cmpi slt, %3, %4 : vector<8x128xi32>
    %cst_3 = arith.constant -3.40282347E+38 : f32
    %6 = vector.broadcast %cst_3 : f32 to vector<8x128xf32>
    %7 = arith.select %5, %2, %6 : vector<8x128xi1>, vector<8x128xf32>
    %cst_4 = arith.constant dense<0xFF800000> : vector<8xf32>
    %8 = vector.multi_reduction <maximumf>, %7, %cst_4 [1] : vector<8x128xf32> to vector<8xf32>
    %9 = vector.shape_cast %8 : vector<8xf32> to vector<8x1xf32>
    %10 = vector.broadcast %9 : vector<8x1xf32> to vector<8x128xf32>
    %11 = arith.subf %7, %10 : vector<8x128xf32>
    %12 = math.exp %11 : vector<8x128xf32>
    %cst_5 = arith.constant dense<0.000000e+00> : vector<8xf32>
    %13 = vector.multi_reduction <add>, %12, %cst_5 [1] : vector<8x128xf32> to vector<8xf32>
    %14 = vector.shape_cast %13 : vector<8xf32> to vector<8x1xf32>
    %15 = math.log %14 : vector<8x1xf32>
    %16 = vector.broadcast %15 : vector<8x1xf32> to vector<8x128xf32>
    %17 = arith.subf %11, %16 : vector<8x128xf32>
    %c0_6 = arith.constant 0 : index
    %c0_7 = arith.constant 0 : index
    %18 = vector.load %arg3[%c0_6, %c0_7] : memref<8x128xf32, #tpu.memory_space<vmem>>, vector<8x128xf32>
    tpu.vector_store %arg3[%c0_6, %c0_7], %17 {strides = array<i32>} : memref<8x128xf32, #tpu.memory_space<vmem>>, vector<8x128xf32>,
    return
  }
  func.func @transform_0(%arg0: i32) -> (i32, i32) {
    %c0_i32 = arith.constant 0 : i32
    %c0_i32_0 = arith.constant 0 : i32
    return %arg0, %c0_i32 : i32, i32
  }
  func.func @transform_1(%arg0: i32) -> (i32, i32) {
    %c0_i32 = arith.constant 0 : i32
    %c0_i32_0 = arith.constant 0 : i32
    %c0_i32_1 = arith.constant 0 : i32
    return %c0_i32, %c0_i32_0 : i32, i32
  }
  func.func @transform_2(%arg0: i32) -> (i32, i32) {
    %c0_i32 = arith.constant 0 : i32
    %c0_i32_0 = arith.constant 0 : i32
    return %arg0, %c0_i32 : i32, i32
  }
}

</mosaic_0001>

<bundles_post_ra>
// kernel: slot_model_forward.1
= control target key start
LH: loop header
LB: loop body
LE: loop exit
PB: predicated region body
PF: predicated region fallthrough
CT: control target
= control target key end

     0   :  { %v200_v0 = vmov 0.0|0.0   ;;  %vm201_vm0 = vmmov 0   ;;  %v202_v4 = vmov 0.0   ;;  %v98_v27 = vlaneseq  ;;  %s272_s1 = inlined_call_operand.vmem [shape: f32[128,128], index: 1, kind: input, shape index: {}]   ;;  %s273_s0 = inlined_call_operand.vmem [shape: f32[8,128], index: 0, kind: input, shape index: {}]   ;;  %s274_s2 = inlined_call_operand.vmem [shape: f32[8,128], index: 2, kind: output, shape index: {}]  }
   0x1   :  { %169 = vmatprep.subr.bf16.mxu0 %v200_v0  ;;  %v12_v1 = vld [vmem:[%s272_s1] sm:$0xff]  ;;  %v13_v2 = vld [vmem:[%s272_s1 + $0x8] sm:$0xff]  ;;  %v14_v3 = vld [vmem:[%s272_s1 + $0x10] sm:$0xff]  ;;  %166 = vmatprep.mubr.msk.f32.mxu0 %vm201_vm0, %v202_v4 }
   0x2   :  { %v170_v5 = vpack.c.bf16 %v13_v2, %v12_v1  ;;  %v15_v6 = vld [vmem:[%s272_s1 + $0x18] sm:$0xff]  ;;  %v16_v8 = vld [vmem:[%s272_s1 + $0x20] sm:$0xff]  ;;  %v17_v9 = vld [vmem:[%s272_s1 + $0x28] sm:$0xff]  ;;  %v99_v28 = vand.u32 127, %v98_v27 }
   0x3   :  { %v173_v7 = vpack.c.bf16 %v15_v6, %v14_v3  ;;  %v176_v10 = vpack.c.bf16 %v17_v9, %v16_v8  ;;  %v18_v11 = vld [vmem:[%s272_s1 + $0x30] sm:$0xff]  ;;  %v19_v12 = vld [vmem:[%s272_s1 + $0x38] sm:$0xff]  ;;  %v20_v14 = vld [vmem:[%s272_s1 + $0x40] sm:$0xff] }
   0x4   :  { %171 = vmatpush3.bf16.msra.mxu0 %v170_v5  ;;  %v179_v13 = vpack.c.bf16 %v19_v12, %v18_v11  ;;  %v21_v15 = vld [vmem:[%s272_s1 + $0x48] sm:$0xff]  ;;  %v22_v17 = vld [vmem:[%s272_s1 + $0x50] sm:$0xff]  ;;  %v23_v18 = vld [vmem:[%s272_s1 + $0x58] sm:$0xff]  ;;  %vm100_vm1 = vcmp.lt.s32.totalorder %v99_v28, 64 }
   0x5   :  { %172 = vmatprep.subr.bf16.mxu0 %v200_v0  ;;  %v182_v16 = vpack.c.bf16 %v21_v15, %v20_v14  ;;  %v185_v19 = vpack.c.bf16 %v23_v18, %v22_v17  ;;  %v24_v20 = vld [vmem:[%s272_s1 + $0x60] sm:$0xff]  ;;  %v25_v21 = vld [vmem:[%s272_s1 + $0x68] sm:$0xff]  ;;  %v26_v23 = vld [vmem:[%s272_s1 + $0x70] sm:$0xff] }
   0x6   :  { %v188_v22 = vpack.c.bf16 %v25_v21, %v24_v20  ;;  %v27_v24 = vld [vmem:[%s272_s1 + $0x78] sm:$0xff]  ;;  %v11_v26 = vld [vmem:[%s273_s0] sm:$0xff] }
   0x7   :  { %v191_v25 = vpack.c.bf16 %v27_v24, %v26_v23 }
   0x8   :  { %174 = vmatpush3.bf16.msra.mxu0 %v173_v7 }
   0x9   :  { %175 = vmatprep.subr.bf16.mxu0 %v200_v0 }
   0xc   :  { %177 = vmatpush3.bf16.msra.mxu0 %v176_v10 }
   0xd   :  { %178 = vmatprep.subr.bf16.mxu0 %v200_v0 }
  0x10   :  { %180 = vmatpush3.bf16.msra.mxu0 %v179_v13 }
  0x11   :  { %181 = vmatprep.subr.bf16.mxu0 %v200_v0 }
  0x14   :  { %183 = vmatpush3.bf16.msra.mxu0 %v182_v16 }
  0x15   :  { %184 = vmatprep.subr.bf16.mxu0 %v200_v0 }
  0x18   :  { %186 = vmatpush3.bf16.msra.mxu0 %v185_v19 }
  0x19   :  { %187 = vmatprep.subr.bf16.mxu0 %v200_v0 }
  0x1c   :  { %189 = vmatpush3.bf16.msra.mxu0 %v188_v22 }
  0x1d   :  { %190 = vmatprep.subr.bf16.mxu0 %v200_v0 }
  0x20   :  { %192 = vmatpush3.bf16.msra.mxu0 %v191_v25 }
  0x23   :  { %167 = vmatmul.mubr.f32.vlgmr.msra.gmra.mrb[0].mxu0 %v11_v26 }
  0xf6   :  { %v94_v29 = vpop.f32.mrb[0].mxu0 }
  0xf7   :  { %v168_v30 = vpop.f32.mrb[1].mxu0  ;;  %v101_v31 = vsel %vm100_vm1, %v94_v29, -3.4028235e+38 }
  0xf8   :  { %102 = vmax.xlane.f32.xlu0 %v101_v31 }
 0x185   :  { %v103_v32 = vpop.xlane.xlu0 %102 }
 0x186   :  { %v104_v33 = vsub.f32 %v101_v31, %v103_v32 }
 0x188   :  { %v105_v34 = vmul.f32 1.442695, %v104_v33 }
 0x18a   :  { %196 = vpow2.f32 %v105_v34 }
 0x194   :  { %v197_v35 = vpop.eup %196 }
 0x195   :  { %107 = vadd.xlane.f32.xlu0 %v197_v35 }
 0x222   :  { %v108_v36 = vpop.xlane.xlu0 %107 }
 0x223   :  { %198 = vlog2.f32 %v108_v36 }
 0x22d   :  { %v199_v37 = vpop.eup %198 }
 0x22e   :  { %v110_v38 = vmul.f32 0.6931472, %v199_v37 }
 0x230   :  { %v111_v39 = vsub.f32 %v104_v33, %v110_v38 }
 0x232   :  { %112 = vst [vmem:[%s274_s2] sm:$0xff] %v111_v39 }

</bundles_post_ra>
